<compile_context>
chip_gen: v5e
topology: v5e:2x2
jax: 0.10.0
libtpu: 0.0.40
codegen_flags: <defaults>
</compile_context>

<pallas_src>
import functools

import jax
import jax.numpy as jnp
from jax.experimental import pallas as pl
from jax.experimental.pallas import tpu as pltpu

STEM_C = 32   # stem conv output channels ("in_features" of the new head)
KSIZE = 3     # stem conv kernel size (stride 1, padding 1)


# ----------------------------- Pallas kernel -------------------------------

def _fold_encoder_kernel(xp_ref, tw_ref, tb_ref, gh_ref, hb_ref, o_ref, *,
                         inv_hw):
    """Fused conv stem (banded matmuls) -> ReLU -> GAP -> head Linear.

    xp_ref : (Hp, Wp*Cin)        bf16 zero-padded image rows (one sample)
    tw_ref : (3, Wp*Cin, W*Cout) bf16 banded conv weights (one per row tap)
    tb_ref : (1, W*Cout)         f32 conv bias tiled over w
    gh_ref : (W*Cout, F)         f32 head weight tiled over w
    hb_ref : (1, F)              f32 head bias
    o_ref  : (1, 1, F)           f32 output features
    """
    hp = xp_ref.shape[0]
    h_out = hp - (KSIZE - 1)
    wcout = tw_ref.shape[2]

    # conv stem: 3 MXU dots (one per kernel row), bf16 x bf16 -> f32.
    acc = jnp.zeros((h_out, wcout), jnp.float32)
    for dy in range(KSIZE):                      # static unroll
        acc += jnp.dot(xp_ref[dy:dy + h_out, :], tw_ref[dy],
                       preferred_element_type=jnp.float32)
    conv = jnp.maximum(acc + tb_ref[...], 0.0)   # (H, W*Cout) f32

    # global average pool (sum over rows; the w-sum is folded into gh).
    pooled = jnp.sum(conv, axis=0, keepdims=True) * inv_hw   # (1, W*Cout)

    # head Linear: out[f] = sum_{w,co} pooled[w*Cout+co] * head_w[co,f] + b.
    o_ref[0] = (jnp.dot(pooled, gh_ref[...],
                        preferred_element_type=jnp.float32)
                + hb_ref[...])


# ------------------------------- glue (JAX) --------------------------------

def fold_encoder_forward(x_nchw, params):
    n, cin, h, w = x_nchw.shape
    cout = params["conv_b"].shape[0]
    feat = params["head_w"].shape[1]
    hp, wp = h + KSIZE - 1, w + KSIZE - 1

    # bf16 BEFORE padding (halves wrapper-side HBM traffic); no im2col tensor.
    x_nhwc = jnp.transpose(x_nchw, (0, 2, 3, 1)).astype(jnp.bfloat16)
    xp = jnp.pad(x_nhwc, ((0, 0), (1, 1), (1, 1), (0, 0)))
    xp = xp.reshape(n, hp, wp * cin)                          # (N, Hp, Wp*Cin)

    # Banded conv weights: tw[dy, wp*Cin+ci, w*Cout+co] = cw[dy, wp-w, ci, co]
    # (0 outside the 3-tap band).  Built once; stays VMEM-resident.
    cw = params["conv_w"].astype(jnp.float32)                 # (3, 3, Cin, Cout)
    sel = (jnp.arange(wp)[None, :, None] ==
           (jnp.arange(w)[None, None, :] +
            jnp.arange(KSIZE)[:, None, None])).astype(jnp.float32)   # (3,Wp,W)
    tw = jnp.einsum("xpw,yxio->ypiwo", sel, cw)               # (3,Wp,Cin,W,Cout)
    tw = tw.reshape(KSIZE, wp * cin, w * cout).astype(jnp.bfloat16)

    tb = jnp.tile(params["conv_b"].astype(jnp.float32), w).reshape(1, w * cout)
    gh = jnp.tile(params["head_w"].astype(jnp.float32), (w, 1))   # (W*Cout, F)
    hb = params["head_b"].reshape(1, -1).astype(jnp.float32)

    kernel = functools.partial(_fold_encoder_kernel, inv_hw=1.0 / (h * w))

    cost = pl.CostEstimate(
        flops=n * (2 * h * KSIZE * wp * cin * w * cout + 2 * w * cout * feat),
        transcendentals=0,
        bytes_accessed=(xp.size * 2 + tw.size * 2
                        + (tb.size + gh.size + hb.size + n * feat) * 4),
    )

    out = pl.pallas_call(
        kernel,
        out_shape=jax.ShapeDtypeStruct((n, 1, feat), jnp.float32),
        grid_spec=pltpu.PrefetchScalarGridSpec(
            num_scalar_prefetch=0,
            grid=(n,),
            in_specs=[
                pl.BlockSpec((pl.Squeezed(), hp, wp * cin), lambda b: (b, 0, 0)),
                pl.BlockSpec((KSIZE, wp * cin, w * cout), lambda b: (0, 0, 0)),
                pl.BlockSpec((1, w * cout), lambda b: (0, 0)),
                pl.BlockSpec((w * cout, feat), lambda b: (0, 0)),
                pl.BlockSpec((1, feat), lambda b: (0, 0)),
            ],
            out_specs=pl.BlockSpec((1, 1, feat), lambda b: (b, 0, 0)),
        ),
        compiler_params=pltpu.CompilerParams(
            dimension_semantics=("parallel",)),
        cost_estimate=cost,
    )(xp, tw, tb, gh, hb)

    return out.reshape(n, feat)


def init_params(key, cin=3, feat_size=64):
    """Deterministic synthetic parameters (shapes from the module __init__)."""
    k1, k2, k3, k4 = jax.random.split(key, 4)
    fan_in = KSIZE * KSIZE * cin
    conv_w = (jax.random.normal(k1, (KSIZE, KSIZE, cin, STEM_C), jnp.float32)
              / jnp.sqrt(fan_in))
    conv_b = 0.01 * jax.random.normal(k2, (STEM_C,), jnp.float32)
    head_w = (jax.random.normal(k3, (STEM_C, feat_size), jnp.float32)
              / jnp.sqrt(STEM_C))
    head_b = 0.01 * jax.random.normal(k4, (feat_size,), jnp.float32)
    return dict(conv_w=conv_w, conv_b=conv_b, head_w=head_w, head_b=head_b)


def reference_forward(x_nchw, params):
    """Pure-JAX reference with matching bf16-operand / f32-accumulate numerics."""
    x = jnp.transpose(x_nchw, (0, 2, 3, 1)).astype(jnp.bfloat16).astype(jnp.float32)
    cw = params["conv_w"].astype(jnp.bfloat16).astype(jnp.float32)
    conv = jax.lax.conv_general_dilated(
        x, cw, window_strides=(1, 1), padding="SAME",
        dimension_numbers=("NHWC", "HWIO", "NHWC"),
        precision=jax.lax.Precision.HIGHEST)
    conv = jnp.maximum(conv + params["conv_b"], 0.0)
    pooled = conv.mean(axis=(1, 2))                           # (N, Cout)
    return (jnp.dot(pooled, params["head_w"],
                    precision=jax.lax.Precision.HIGHEST) + params["head_b"])


if __name__ == "__main__":
    key = jax.random.PRNGKey(0)
    kx, kp = jax.random.split(key)

    # small shapes: batch=2, 3 input channels (RGB), 16x16 spatial, hidden=64
    x = jax.random.normal(kx, (2, 3, 16, 16), jnp.float32)
    params = init_params(kp, cin=3, feat_size=64)

    fwd = jax.jit(fold_encoder_forward)
    out = jax.block_until_ready(fwd(x, params))
    ref = reference_forward(x, params)
    assert out.shape == (2, 64), out.shape
    # bf16 MXU products with f32 accumulation bound the mismatch well below 1e-2.
    assert jnp.allclose(out, ref, atol=1e-2, rtol=1e-2), \
        float(jnp.max(jnp.abs(out - ref)))

    # odd, non-8/128-aligned spatial size: blocks equal the full array dims,
    # so no padding or in-kernel masking is needed.
    x2 = jax.random.normal(kx, (2, 3, 10, 10), jnp.float32)
    out2 = jax.block_until_ready(fwd(x2, params))
    ref2 = reference_forward(x2, params)
    assert out2.shape == (2, 64), out2.shape
    assert jnp.allclose(out2, ref2, atol=1e-2, rtol=1e-2), \
        float(jnp.max(jnp.abs(out2 - ref2)))

    print("KERNEL_OK")
</pallas_src>

<mosaic_0001>
module attributes {stable_mosaic.version = 11 : i64} {
  func.func @_fold_encoder_kernel(%arg0: i32, %arg1: memref<1x18x54xbf16, #tpu.memory_space<vmem>>, %arg2: memref<3x54x512xbf16, #tpu.memory_space<vmem>>, %arg3: memref<1x512xf32, #tpu.memory_space<vmem>>, %arg4: memref<512x64xf32, #tpu.memory_space<vmem>>, %arg5: memref<1x64xf32, #tpu.memory_space<vmem>>, %arg6: memref<1x1x64xf32, #tpu.memory_space<vmem>>) attributes {dimension_semantics = [#tpu.dimension_semantics<parallel>], iteration_bounds = array<i64: 2>, scalar_prefetch = 0 : i64, scratch_operands = 0 : i64, tpu.core_type = #tpu.core_type<tc>, window_params = [{transform_indices = @transform_0, window_bounds = array<i64: 1, 18, 54>}, {pipeline_mode = #tpu.pipeline_mode<synchronous>, transform_indices = @transform_1, window_bounds = array<i64: 3, 54, 512>}, {pipeline_mode = #tpu.pipeline_mode<synchronous>, transform_indices = @transform_2, window_bounds = array<i64: 1, 512>}, {pipeline_mode = #tpu.pipeline_mode<synchronous>, transform_indices = @transform_3, window_bounds = array<i64: 512, 64>}, {pipeline_mode = #tpu.pipeline_mode<synchronous>, transform_indices = @transform_4, window_bounds = array<i64: 1, 64>}, {transform_indices = @transform_5, window_bounds = array<i64: 1, 1, 64>}]} {
    %cst = arith.constant 0.000000e+00 : f32
    %0 = vector.broadcast %cst : f32 to vector<16x512xf32>
    %c0 = arith.constant 0 : index
    %c0_0 = arith.constant 0 : index
    %c0_1 = arith.constant 0 : index
    %1 = vector.load %arg1[%c0, %c0_0, %c0_1] : memref<1x18x54xbf16, #tpu.memory_space<vmem>>, vector<1x16x54xbf16>
    %2 = vector.shape_cast %1 : vector<1x16x54xbf16> to vector<16x54xbf16>
    %c0_2 = arith.constant 0 : index
    %c0_3 = arith.constant 0 : index
    %c0_4 = arith.constant 0 : index
    %3 = vector.load %arg2[%c0_2, %c0_3, %c0_4] : memref<3x54x512xbf16, #tpu.memory_space<vmem>>, vector<1x54x512xbf16>
    %4 = vector.shape_cast %3 : vector<1x54x512xbf16> to vector<54x512xbf16>
    %cst_5 = arith.constant dense<0.000000e+00> : vector<16x512xf32>
    %5 = tpu.matmul %2, %4, %cst_5 {dimension_numbers = #tpu.dot_dimension_numbers<[1], [0], [0], [1], [0, 0, 1, 1], [], []>} : vector<16x54xbf16>, vector<54x512xbf16>, vector<16x512xf32> -> vector<16x512xf32>
    %6 = arith.addf %0, %5 : vector<16x512xf32>
    %c0_6 = arith.constant 0 : index
    %c1 = arith.constant 1 : index
    %c0_7 = arith.constant 0 : index
    %7 = vector.load %arg1[%c0_6, %c1, %c0_7] : memref<1x18x54xbf16, #tpu.memory_space<vmem>>, vector<1x16x54xbf16>
    %8 = vector.shape_cast %7 : vector<1x16x54xbf16> to vector<16x54xbf16>
    %c1_8 = arith.constant 1 : index
    %c0_9 = arith.constant 0 : index
    %c0_10 = arith.constant 0 : index
    %9 = vector.load %arg2[%c1_8, %c0_9, %c0_10] : memref<3x54x512xbf16, #tpu.memory_space<vmem>>, vector<1x54x512xbf16>
    %10 = vector.shape_cast %9 : vector<1x54x512xbf16> to vector<54x512xbf16>
    %cst_11 = arith.constant dense<0.000000e+00> : vector<16x512xf32>
    %11 = tpu.matmul %8, %10, %cst_11 {dimension_numbers = #tpu.dot_dimension_numbers<[1], [0], [0], [1], [0, 0, 1, 1], [], []>} : vector<16x54xbf16>, vector<54x512xbf16>, vector<16x512xf32> -> vector<16x512xf32>
    %12 = arith.addf %6, %11 : vector<16x512xf32>
    %c0_12 = arith.constant 0 : index
    %c2 = arith.constant 2 : index
    %c0_13 = arith.constant 0 : index
    %13 = vector.load %arg1[%c0_12, %c2, %c0_13] : memref<1x18x54xbf16, #tpu.memory_space<vmem>>, vector<1x16x54xbf16>
    %14 = vector.shape_cast %13 : vector<1x16x54xbf16> to vector<16x54xbf16>
    %c2_14 = arith.constant 2 : index
    %c0_15 = arith.constant 0 : index
    %c0_16 = arith.constant 0 : index
    %15 = vector.load %arg2[%c2_14, %c0_15, %c0_16] : memref<3x54x512xbf16, #tpu.memory_space<vmem>>, vector<1x54x512xbf16>
    %16 = vector.shape_cast %15 : vector<1x54x512xbf16> to vector<54x512xbf16>
    %cst_17 = arith.constant dense<0.000000e+00> : vector<16x512xf32>
    %17 = tpu.matmul %14, %16, %cst_17 {dimension_numbers = #tpu.dot_dimension_numbers<[1], [0], [0], [1], [0, 0, 1, 1], [], []>} : vector<16x54xbf16>, vector<54x512xbf16>, vector<16x512xf32> -> vector<16x512xf32>
    %18 = arith.addf %12, %17 : vector<16x512xf32>
    %c0_18 = arith.constant 0 : index
    %c0_19 = arith.constant 0 : index
    %19 = vector.load %arg3[%c0_18, %c0_19] : memref<1x512xf32, #tpu.memory_space<vmem>>, vector<1x512xf32>
    %20 = vector.broadcast %19 : vector<1x512xf32> to vector<16x512xf32>
    %21 = arith.addf %18, %20 : vector<16x512xf32>
    %cst_20 = arith.constant 0.000000e+00 : f32
    %22 = vector.broadcast %cst_20 : f32 to vector<16x512xf32>
    %23 = arith.maximumf %21, %22 : vector<16x512xf32>
    %cst_21 = arith.constant dense<0.000000e+00> : vector<512xf32>
    %24 = vector.multi_reduction <add>, %23, %cst_21 [0] : vector<16x512xf32> to vector<512xf32>
    %25 = vector.shape_cast %24 : vector<512xf32> to vector<1x512xf32>
    %cst_22 = arith.constant 3.906250e-03 : f32
    %26 = vector.broadcast %cst_22 : f32 to vector<1x512xf32>
    %27 = arith.mulf %25, %26 : vector<1x512xf32>
    %c0_23 = arith.constant 0 : index
    %c0_24 = arith.constant 0 : index
    %28 = vector.load %arg4[%c0_23, %c0_24] : memref<512x64xf32, #tpu.memory_space<vmem>>, vector<512x64xf32>
    %cst_25 = arith.constant dense<0.000000e+00> : vector<1x64xf32>
    %29 = tpu.matmul %27, %28, %cst_25 {dimension_numbers = #tpu.dot_dimension_numbers<[1], [0], [0], [1], [0, 0, 1, 1], [], []>} : vector<1x512xf32>, vector<512x64xf32>, vector<1x64xf32> -> vector<1x64xf32>
    %c0_26 = arith.constant 0 : index
    %c0_27 = arith.constant 0 : index
    %30 = vector.load %arg5[%c0_26, %c0_27] : memref<1x64xf32, #tpu.memory_space<vmem>>, vector<1x64xf32>
    %31 = arith.addf %29, %30 : vector<1x64xf32>
    %c0_28 = arith.constant 0 : index
    %c0_29 = arith.constant 0 : index
    %c0_30 = arith.constant 0 : index
    %32 = vector.load %arg6[%c0_28, %c0_29, %c0_30] : memref<1x1x64xf32, #tpu.memory_space<vmem>>, vector<1x1x64xf32>
    %33 = vector.shape_cast %32 : vector<1x1x64xf32> to vector<1x64xf32>
    %34 = vector.shape_cast %31 : vector<1x64xf32> to vector<1x1x64xf32>
    tpu.vector_store %arg6[%c0_28, %c0_29, %c0_30], %34 {strides = array<i32>} : memref<1x1x64xf32, #tpu.memory_space<vmem>>, vector<1x1x64xf32>,
    return
  }
  func.func @transform_0(%arg0: i32) -> (i32, i32, i32) {
    %c0_i32 = arith.constant 0 : i32
    %c0_i32_0 = arith.constant 0 : i32
    %c0_i32_1 = arith.constant 0 : i32
    return %arg0, %c0_i32, %c0_i32_0 : i32, i32, i32
  }
  func.func @transform_1(%arg0: i32) -> (i32, i32, i32) {
    %c0_i32 = arith.constant 0 : i32
    %c0_i32_0 = arith.constant 0 : i32
    %c0_i32_1 = arith.constant 0 : i32
    %c0_i32_2 = arith.constant 0 : i32
    return %c0_i32, %c0_i32_0, %c0_i32_1 : i32, i32, i32
  }
  func.func @transform_2(%arg0: i32) -> (i32, i32) {
    %c0_i32 = arith.constant 0 : i32
    %c0_i32_0 = arith.constant 0 : i32
    %c0_i32_1 = arith.constant 0 : i32
    return %c0_i32, %c0_i32_0 : i32, i32
  }
  func.func @transform_3(%arg0: i32) -> (i32, i32) {
    %c0_i32 = arith.constant 0 : i32
    %c0_i32_0 = arith.constant 0 : i32
    %c0_i32_1 = arith.constant 0 : i32
    return %c0_i32, %c0_i32_0 : i32, i32
  }
  func.func @transform_4(%arg0: i32) -> (i32, i32) {
    %c0_i32 = arith.constant 0 : i32
    %c0_i32_0 = arith.constant 0 : i32
    %c0_i32_1 = arith.constant 0 : i32
    return %c0_i32, %c0_i32_0 : i32, i32
  }
  func.func @transform_5(%arg0: i32) -> (i32, i32, i32) {
    %c0_i32 = arith.constant 0 : i32
    %c0_i32_0 = arith.constant 0 : i32
    %c0_i32_1 = arith.constant 0 : i32
    return %arg0, %c0_i32, %c0_i32_0 : i32, i32, i32
  }
}

</mosaic_0001>

<bundles_post_ra>
// kernel: tile.13
= control target key start
LH: loop header
LB: loop body
LE: loop exit
PB: predicated region body
PF: predicated region fallthrough
CT: control target
= control target key end

     0   :  { %s28_s0 = inlined_call_operand.vmem [shape: f32[32], index: 0, kind: input, shape index: {}]   ;;  %s29_s1 = inlined_call_operand.vmem [shape: f32[16,32], index: 1, kind: output, shape index: {}]  }
   0x1   :  { %v4_v0 = vld [vmem:[%s28_s0] ss:$0 sm:$0xff] }
   0x2   :  { %5 = vst [vmem:[%s29_s1] sm:$0xff] %v4_v0 }
   0x3   :  { %8 = vst [vmem:[%s29_s1 + $0x8] sm:$0xff] %v4_v0 }

// kernel: tile.14
= control target key start
LH: loop header
LB: loop body
LE: loop exit
PB: predicated region body
PF: predicated region fallthrough
CT: control target
= control target key end

     0   :  { %s56_s8 = smov 96   ;;  %s57_s11 = smov 32   ;;  %vm3_vm0 = vcmask 261120   ;;  %vm9_vm1 = vcmask 1048320   ;;  %vm15_vm2 = vcmask 785920   ;;  %vm21_vm3 = vcmask 523520   ;;  %s93_s0 = inlined_call_operand.vmem [shape: f32[16,32], index: 0, kind: input, shape index: {}]   ;;  %s94_s1 = inlined_call_operand.vmem [shape: f32[1,512], index: 1, kind: output, shape index: {}]  }
   0x1   :  { %v47_v0 = vld [vmem:[%s93_s0 + $0x3] ss:$4 sm:$0xf]   ;;  %v49_v1 = vld [vmem:[%s93_s0 + $0x1] ss:$4 sm:$0xf]  }
   0x2   :  { %7 = vrot.lane.b32.xlu0 %v47_v0, %s56_s8  ;;  %19 = vrot.lane.b32.xlu1 %v49_v1, %s57_s11  ;;  %v48_v2 = vld [vmem:[%s93_s0 + $0x2] ss:$4 sm:$0xf]   ;;  %s58_s14 = smov 64  }
   0x3   :  { %v2_v3 = vld [vmem:[%s93_s0] ss:$4 sm:$0xf]  }
   0x4   :  { %4 = vst.msk [vmem:[#allocation0] ss:$8 sm:$0xf] %vm3_vm0, %v2_v3  }
   0xa   :  { %13 = vrot.lane.b32.xlu0 %v48_v2, %s58_s14 }
  0x74   :  { %v8_v4 = vpop.permute.xlu0 %7   ;;  %v20_v5 = vpop.permute.xlu1 %19  }
  0x75   :  { %10 = vst.msk [vmem:[#allocation0] ss:$8 sm:$0xf] %vm9_vm1, %v8_v4  }
  0x7c   :  { %v14_v6 = vpop.permute.xlu0 %13  }
  0x7d   :  { %16 = vst.msk [vmem:[#allocation0] ss:$8 sm:$0xf] %vm15_vm2, %v14_v6  }
  0x7e   :  { %22 = vst.msk [vmem:[#allocation0] ss:$8 sm:$0xf] %vm21_vm3, %v20_v5  }
  0x85   :  { %v25_v7 = vld [vmem:[#allocation0] sm:$0x1]  ;;  %v30_v8 = vld [vmem:[#allocation0 + $0x8] sm:$0x1]  ;;  %v36_v9 = vld [vmem:[#allocation0 + $0x10] sm:$0x1] }
  0x86   :  { %28 = vst [vmem:[%s94_s1] sm:$0x1] %v25_v7  ;;  %v42_v10 = vld [vmem:[#allocation0 + $0x18] sm:$0x1] }
  0x87   :  { %50 = vst [vmem:[%s94_s1 + $0x1] sm:$0x1] %v30_v8 }
  0x88   :  { %51 = vst [vmem:[%s94_s1 + $0x2] sm:$0x1] %v36_v9 }
  0x89   :  { %52 = vst [vmem:[%s94_s1 + $0x3] sm:$0x1] %v42_v10 }

// kernel: fold_encoder_forward.1
= control target key start
LH: loop header
LB: loop body
LE: loop exit
PB: predicated region body
PF: predicated region fallthrough
CT: control target
= control target key end

     0   :  { %10 = vsyncpa [#allocation3], 0  ;;  %s1970_s0 = inlined_call_operand.vmem [shape: bf16[2,18,54], index: 0, kind: input, shape index: {}]   ;;  %s1971_s1 = inlined_call_operand.vmem [shape: bf16[3,54,512], index: 1, kind: input, shape index: {}]   ;;  %s1972_s2 = inlined_call_operand.vmem [shape: f32[1,512], index: 2, kind: input, shape index: {}]   ;;  %s1973_s3 = inlined_call_operand.vmem [shape: f32[512,64], index: 3, kind: input, shape index: {}]   ;;  %s1974_s4 = inlined_call_operand.vmem [shape: f32[1,64], index: 4, kind: input, shape index: {}]   ;;  %s1975_s5 = inlined_call_operand.hbm [shape: f32[2,1,64], index: 5, kind: output, shape index: {}]  }
   0x1   :  { %12 = vsyncpa [#allocation3 + $0x1], 0  ;;  %s1372_s18 = smov 0   ;;  %s1374_s19 = smov 0  }
   0x2   :  { %s1376_s20 = smov 0   ;;  %s1378_s21 = smov 0  }
   0x3 LB: > { %s1393_s22 = sadd.s32 4294967295, %s1340_s21   ;;  %s1004_s23 = sadd.s32 4294967294, %s1340_s21   ;;  %s1340_s21 = sphi %s1378_s21, %s1981_s21   ;;  %s1336_s20 = sphi %s1376_s20, %s1980_s20   ;;  %s1332_s19 = sphi %s1374_s19, %s1979_s19   ;;  %s1328_s18 = sphi %s1372_s18, %s1978_s18  }
   0x4   : > { %s1397_s24 = sadd.s32 1, %s1340_s21   ;;  %s135_s25 = sadd.s32 1, %s1336_s20 }
   0x5   : > { %s132_s26 = ssub.s32 %s1340_s21, %s1397_s24  ;;  %p145_p0 = scmp.ne.s32.totalorder %s1336_s20, %s1332_s19 }
   0x6   : > { %p133_p1 = scmp.eq.s32.totalorder %s132_s26, 0  ;;  %p146_p2 = scmp.eq.s32.totalorder %s1393_s22, 1 }
   0x7   : > { %p151_p3 = scmp.ne.s32.totalorder %s1332_s19, %s1328_s18  ;;  %p152_p4 = scmp.eq.s32.totalorder %s1004_s23, 1 }
   0x8   : > { %s1408_s27 = scalar_select %p133_p1, %s1336_s20, %s135_s25  }
   0x9   : > { %p1410_p5 = por %p146_p2, %p145_p0  ;;  %p1414_p6 = por %p152_p4, %p151_p3 }
   0xa   : > { %p1007_p7 = scmp.ge.s32.totalorder %s1340_s21, 1  ;;  %p190_p8 = scmp.lt.s32.totalorder %s1340_s21, 3 }
   0xc   : > { %p191_p9 = pnand %p1007_p7, %p190_p8 }
   0xd   : > { %p217_p10 = scmp.lt.s32.totalorder (!%p191_p9), %s1393_s22, 1  ;;  %s215_s16 = sand.u32 (!%p191_p9), 1, %s1332_s19  }
   0xe   : > { %194 = sbr.rel (%p191_p9) target bundleno = 377 (0x179), region = 40  ;;  %s945_s25 = scalar_lea.hbm (!%p191_p9), %s1975_s5, %s1393_s22 }
   0xf   : > { %s216_s26 = scalar_lea.vmem (!%p191_p9), [#allocation2], %s215_s16  ;;  %s949_s6 = sshll.u32 (!%p191_p9), %s945_s25, 4  ;;  %s950_s6 = int_to_ptr.hbm [resolvable:$true] %s949_s6 }
  0x10   : > { %s947_s30 = sshll.u32 (!%p191_p9), %s216_s26, 4  ;;  %s937_s7 = scalar_lea.sflag (!%p191_p9), [#allocation3], %s215_s16  ;;  %s948_s30 = int_to_ptr.vmem [resolvable:$true] %s947_s30 }
  0x13   : > { %v1021_v0 = vld [vmem:[%s1971_s1 + $0xd0] sm:$0x77]  ;;  %vm350_vm0 = vcmask 1042432   ;;  %v1022_v1 = vld [vmem:[%s1971_s1 + $0xd8] sm:$0x77]  ;;  %s218_s15 = scalar_select %p217_p10, %s1393_s22, 1 }
  0x14   : > { %v314_v2 = vunpack.c.l.b16 %v1021_v0  ;;  %v315_v3 = vunpack.c.h.b16 %v1021_v0  ;;  %v316_v4 = vunpack.c.l.b16 %v1022_v1  ;;  %v317_v5 = vunpack.c.h.b16 %v1022_v1  ;;  %v1057_v6 = vld [vmem:[%s1971_s1 + $0xb0] sm:$0xf]  ;;  %v1217_v7 = vld [vmem:[%s1971_s1 + $0xbc] sm:$0xf0]  ;;  %v1215_v8 = vld [vmem:[%s1971_s1 + $0xb4] sm:$0xf] }
  0x15   : > { %v1059_v13 = vld [vmem:[%s1971_s1 + $0xc0] sm:$0xf0]  ;;  %v1065_v14 = vld [vmem:[%s1971_s1 + $0xb8] sm:$0xf]  ;;  %v1218_v15 = vld [vmem:[%s1971_s1 + $0xc4] sm:$0xf0]  ;;  %v1058_v24 = vor.u32 %v1217_v7, %v1057_v6 }
  0x16   : > { %v330_v9 = vpack.c.b16 %v314_v2, %v314_v2  ;;  %v331_v10 = vpack.c.b16 %v315_v3, %v315_v3  ;;  %v332_v11 = vpack.c.b16 %v316_v4, %v316_v4  ;;  %v333_v12 = vpack.c.b16 %v317_v5, %v317_v5  ;;  %v1216_v16 = vld [vmem:[%s1971_s1 + $0xbc] sm:$0xf]  ;;  %v1067_v17 = vld [vmem:[%s1971_s1 + $0xc8] sm:$0xf0]  ;;  %v1041_v18 = vld [vmem:[%s1971_s1 + $0x90] sm:$0xf] }
  0x17   : > { %v1213_v23 = vld [vmem:[%s1971_s1 + $0x9c] sm:$0xf0]  ;;  %v1062_v25 = vor.u32 %v1215_v8, %v1059_v13  ;;  %v1211_v26 = vld [vmem:[%s1971_s1 + $0x94] sm:$0xf]  ;;  %v1043_v27 = vld [vmem:[%s1971_s1 + $0xa0] sm:$0xf0]  ;;  %v1066_v29 = vor.u32 %v1218_v15, %v1065_v14  ;;  %v1070_v30 = vor.u32 %v1216_v16, %v1067_v17 }
  0x18   : > { %v352_v19 = vsel %vm350_vm0, %v330_v9, 0  ;;  %v355_v20 = vsel %vm350_vm0, %v331_v10, 0  ;;  %v358_v21 = vsel %vm350_vm0, %v332_v11, 0  ;;  %v361_v22 = vsel %vm350_vm0, %v333_v12, 0  ;;  %v1049_v28 = vld [vmem:[%s1971_s1 + $0x98] sm:$0xf] }
  0x19   : > { %367 = vmatpush.bf16.msra.mxu0 %v352_v19  ;;  %381 = vmatpush.bf16.msra.mxu1 %v355_v20  ;;  %v1214_v31 = vld [vmem:[%s1971_s1 + $0xa4] sm:$0xf0]  ;;  %v1212_v32 = vld [vmem:[%s1971_s1 + $0x9c] sm:$0xf]  ;;  %v1051_v33 = vld [vmem:[%s1971_s1 + $0xa8] sm:$0xf0]  ;;  %v1042_v35 = vor.u32 %v1213_v23, %v1041_v18  ;;  %v1046_v38 = vor.u32 %v1211_v26, %v1043_v27 }
  0x1a   : > { %395 = vmatpush.bf16.msra.mxu2 %v358_v21  ;;  %409 = vmatpush.bf16.msra.mxu3 %v361_v22  ;;  %v1025_v34 = vld [vmem:[%s1971_s1 + $0x70] sm:$0xf]  ;;  %v1209_v36 = vld [vmem:[%s1971_s1 + $0x7c] sm:$0xf0]  ;;  %v1207_v37 = vld [vmem:[%s1971_s1 + $0x74] sm:$0xf]  ;;  %v1050_v39 = vor.u32 %v1214_v31, %v1049_v28  ;;  %v1054_v40 = vor.u32 %v1212_v32, %v1051_v33 }
  0x1b   : > { %v1027_v41 = vld [vmem:[%s1971_s1 + $0x80] sm:$0xf0]  ;;  %v238_v42 = vld [vmem:[%s1971_s1 + $0x68] sm:$0x77]  ;;  %v1033_v44 = vld [vmem:[%s1971_s1 + $0x78] sm:$0xf]  ;;  %v1026_v52 = vor.u32 %v1209_v36, %v1025_v34 }
  0x1c   : > { %v237_v43 = vld [vmem:[%s1971_s1 + $0x60] sm:$0x77]  ;;  %v1210_v45 = vld [vmem:[%s1971_s1 + $0x84] sm:$0xf0]  ;;  %s1238_s10 = smul.u32 12, %s218_s15  ;;  %v459_v46 = vunpack.c.l.b16 %v238_v42  ;;  %v460_v49 = vunpack.c.h.b16 %v238_v42  ;;  %v1030_v53 = vor.u32 %v1207_v37, %v1027_v41  ;;  %vm346_vm2 = vcmask 441344  }
  0x1d   : > { %368 = vmatpush.bf16.msra.mxu0 %v1058_v24  ;;  %382 = vmatpush.bf16.msra.mxu1 %v1062_v25  ;;  %v457_v47 = vunpack.c.l.b16 %v237_v43  ;;  %v458_v48 = vunpack.c.h.b16 %v237_v43  ;;  %v1208_v50 = vld [vmem:[%s1971_s1 + $0x7c] sm:$0xf]  ;;  %v1035_v51 = vld [vmem:[%s1971_s1 + $0x88] sm:$0xf0]  ;;  %v1034_v56 = vor.u32 %v1210_v45, %v1033_v44  ;;  %vm263_vm1 = vsmask.f32 7424 }
  0x1e   : > { %396 = vmatpush.bf16.msra.mxu2 %v1066_v29  ;;  %410 = vmatpush.bf16.msra.mxu3 %v1070_v30  ;;  %s1515_s23 = scalar_lea.vmem %s1970_s0, %s1238_s10  ;;  %v475_v54 = vpack.c.b16 %v459_v46, %v459_v46  ;;  %v476_v60 = vpack.c.b16 %v460_v49, %v460_v49  ;;  %v1038_v61 = vor.u32 %v1208_v50, %v1035_v51  ;;  %v1117_v5 = vld [vmem:[%s1971_s1 + $0x48] sm:$0xf]  ;;  %v1206_v8 = vld [vmem:[%s1971_s1 + $0x54] sm:$0xf0]  ;;  %v1109_v9 = vld [vmem:[%s1971_s1 + $0x40] sm:$0xf] }
  0x1f   : > { %v473_v55 = vpack.c.b16 %v457_v47, %v457_v47  ;;  %v1518_v57 = vld [vmem:[%s1515_s23] sm:$0xff]   ;;  %v239_v58 = vld [vmem:[%s1515_s23 + $0x8] sm:$0x1]  ;;  %v474_v59 = vpack.c.b16 %v458_v48, %v458_v48  ;;  %v1205_v12 = vld [vmem:[%s1971_s1 + $0x4c] sm:$0xf0]  ;;  %v1118_v19 = vor.u32 %v1206_v8, %v1117_v5  ;;  %vm578_vm3 = vcmask 1046528  }
  0x20   : > { %v260_v62 = vunpack.c.l.b16 %v239_v58  ;;  %v265_v63 = vshrl.u32 %v1518_v57, 16  ;;  %v267_v0 = vshll.u32 %v1518_v57, 16  ;;  %v498_v3 = vsel %vm350_vm0, %v475_v54, 0  ;;  %v1203_v13 = vld [vmem:[%s1971_s1 + $0x44] sm:$0xf]  ;;  %s1298_s10 = scalar_lea.hbm %s1975_s5, 2 }
  0x21   : > { %369 = vmatpush.bf16.msra.mxu0 %v1042_v35  ;;  %383 = vmatpush.bf16.msra.mxu1 %v1046_v38  ;;  %v492_v4 = vsel %vm350_vm0, %v473_v55, 0  ;;  %v495_v6 = vsel %vm350_vm0, %v474_v59, 0  ;;  %v501_v7 = vsel %vm350_vm0, %v476_v60, 0  ;;  %v1111_v14 = vld [vmem:[%s1971_s1 + $0x50] sm:$0xf0]  ;;  %v1110_v20 = vor.u32 %v1205_v12, %v1109_v9 }
  0x22   : > { %397 = vmatpush.bf16.msra.mxu2 %v1050_v39  ;;  %411 = vmatpush.bf16.msra.mxu3 %v1054_v40  ;;  %v1523_v1 = vpack.c.b16 %v260_v62, %v260_v62  ;;  %v269_v2 = vrot.slane %v267_v0, 1  ;;  %v1204_v15 = vld [vmem:[%s1971_s1 + $0x4c] sm:$0xf]  ;;  %v1119_v16 = vld [vmem:[%s1971_s1 + $0x58] sm:$0xf0]  ;;  %v1114_v25 = vor.u32 %v1203_v13, %v1111_v14  ;;  %vm934_vm4 = vcmask 516096  }
  0x23   : > { %v1101_v18 = vld [vmem:[%s1971_s1 + $0x28] sm:$0xf]  ;;  %v1202_v21 = vld [vmem:[%s1971_s1 + $0x34] sm:$0xf0]  ;;  %v1139_v23 = vld [vmem:[%s1971_s1 + $0x140] sm:$0x77]  ;;  %v1122_v26 = vor.u32 %v1204_v15, %v1119_v16 }
  0x24   : > { %v270_v10 = vor.u32 %v269_v2, %v265_v63  ;;  %v272_v11 = vshll.u32 %v1523_v1, 16  ;;  %v1140_v22 = vld [vmem:[%s1971_s1 + $0x148] sm:$0x77]  ;;  %v1093_v27 = vld [vmem:[%s1971_s1 + $0x20] sm:$0xf]  ;;  %v620_v34 = vunpack.c.l.b16 %v1139_v23  ;;  %v1102_v35 = vor.u32 %v1202_v21, %v1101_v18 }
  0x25   : > { %370 = vmatpush.bf16.msra.mxu0 %v1026_v52  ;;  %384 = vmatpush.bf16.msra.mxu1 %v1030_v53  ;;  %v1201_v28 = vld [vmem:[%s1971_s1 + $0x2c] sm:$0xf0]  ;;  %v1199_v29 = vld [vmem:[%s1971_s1 + $0x24] sm:$0xf]  ;;  %v1095_v30 = vld [vmem:[%s1971_s1 + $0x30] sm:$0xf0]  ;;  %v622_v33 = vunpack.c.l.b16 %v1140_v22  ;;  %v621_v39 = vunpack.c.h.b16 %v1139_v23  ;;  %v623_v40 = vunpack.c.h.b16 %v1140_v22 }
  0x26   : > { %398 = vmatpush.bf16.msra.mxu2 %v1034_v56  ;;  %412 = vmatpush.bf16.msra.mxu3 %v1038_v61  ;;  %v274_v17 = vrot.slane %v272_v11, 1  ;;  %v1200_v31 = vld [vmem:[%s1971_s1 + $0x2c] sm:$0xf]  ;;  %v1103_v32 = vld [vmem:[%s1971_s1 + $0x38] sm:$0xf0]  ;;  %v1094_v36 = vor.u32 %v1201_v28, %v1093_v27  ;;  %v1098_v41 = vor.u32 %v1199_v29, %v1095_v30  ;;  %v636_v51 = vpack.c.b16 %v620_v34, %v620_v34 }
  0x27   : > { %v1085_v37 = vld [vmem:[%s1971_s1 + $0x8] sm:$0xf]  ;;  %v1198_v38 = vld [vmem:[%s1971_s1 + $0x14] sm:$0xf0]  ;;  %v1106_v42 = vor.u32 %v1200_v31, %v1103_v32  ;;  %v1077_v43 = vld [vmem:[%s1971_s1] sm:$0xf]  ;;  %v638_v50 = vpack.c.b16 %v622_v33, %v622_v33  ;;  %v637_v53 = vpack.c.b16 %v621_v39, %v621_v39  ;;  %v639_v54 = vpack.c.b16 %v623_v40, %v623_v40 }
  0x28   : > { %v275_v24 = vsel %vm263_vm1, %v270_v10, %v274_v17  ;;  %v1197_v44 = vld [vmem:[%s1971_s1 + $0xc] sm:$0xf0]  ;;  %v1195_v45 = vld [vmem:[%s1971_s1 + $0x4] sm:$0xf]  ;;  %v1079_v46 = vld [vmem:[%s1971_s1 + $0x10] sm:$0xf0]  ;;  %v1086_v49 = vor.u32 %v1198_v38, %v1085_v37 }
  0x29   : > { %507 = vmatpush.bf16.msrb.mxu0 %v492_v4  ;;  %521 = vmatpush.bf16.msrb.mxu1 %v495_v6  ;;  %v1196_v47 = vld [vmem:[%s1971_s1 + $0xc] sm:$0xf]  ;;  %v1087_v48 = vld [vmem:[%s1971_s1 + $0x18] sm:$0xf0]  ;;  %v1078_v52 = vor.u32 %v1197_v44, %v1077_v43  ;;  %v1082_v55 = vor.u32 %v1195_v45, %v1079_v46  ;;  %v662_v58 = vsel %vm350_vm0, %v638_v50, 0  ;;  %v656_v59 = vsel %vm350_vm0, %v636_v51, 0 }
  0x2a   : > { %535 = vmatpush.bf16.msrb.mxu2 %v498_v3  ;;  %549 = vmatpush.bf16.msrb.mxu3 %v501_v7  ;;  %v1090_v56 = vor.u32 %v1196_v47, %v1087_v48  ;;  %v659_v60 = vsel %vm350_vm0, %v637_v53, 0  ;;  %v665_v61 = vsel %vm350_vm0, %v639_v54, 0  ;;  %v1183_v62 = vld [vmem:[%s1971_s1 + $0x128] sm:$0xf]  ;;  %v1230_v63 = vld [vmem:[%s1971_s1 + $0x134] sm:$0xf0] }
  0x2b   : > { %1071 = vmatmul.msk.bf16.vlgmr.msra.gmra.mxu0 %vm346_vm2, %v275_v24  ;;  %1072 = vmatmul.msk.bf16.vlgmr.msra.gmra.mxu1 %vm346_vm2, %v275_v24  ;;  %v1175_v0 = vld [vmem:[%s1971_s1 + $0x120] sm:$0xf]  ;;  %v1229_v2 = vld [vmem:[%s1971_s1 + $0x12c] sm:$0xf0]  ;;  %v1227_v3 = vld [vmem:[%s1971_s1 + $0x124] sm:$0xf]  ;;  %v1184_v7 = vor.u32 %v1230_v63, %v1183_v62 }
  0x2c   : > { %1073 = vmatmul.msk.bf16.vlgmr.msra.gmra.mxu2 %vm346_vm2, %v275_v24  ;;  %1074 = vmatmul.msk.bf16.vlgmr.msra.gmra.mxu3 %vm346_vm2, %v275_v24  ;;  %v1177_v4 = vld [vmem:[%s1971_s1 + $0x130] sm:$0xf0]  ;;  %v1228_v5 = vld [vmem:[%s1971_s1 + $0x12c] sm:$0xf]  ;;  %v1185_v6 = vld [vmem:[%s1971_s1 + $0x138] sm:$0xf0]  ;;  %v1176_v8 = vor.u32 %v1229_v2, %v1175_v0 }
  0x2d   : > { %508 = vmatpush.bf16.msrb.mxu0 %v1110_v20  ;;  %522 = vmatpush.bf16.msrb.mxu1 %v1114_v25  ;;  %v1167_v9 = vld [vmem:[%s1971_s1 + $0x108] sm:$0xf]  ;;  %v1226_v10 = vld [vmem:[%s1971_s1 + $0x114] sm:$0xf0]  ;;  %v1180_v11 = vor.u32 %v1227_v3, %v1177_v4  ;;  %v1188_v12 = vor.u32 %v1228_v5, %v1185_v6  ;;  %v1159_v13 = vld [vmem:[%s1971_s1 + $0x100] sm:$0xf] }
  0x2e   : > { %536 = vmatpush.bf16.msrb.mxu2 %v1118_v19  ;;  %550 = vmatpush.bf16.msrb.mxu3 %v1122_v26  ;;  %v1225_v14 = vld [vmem:[%s1971_s1 + $0x10c] sm:$0xf0]  ;;  %v1223_v15 = vld [vmem:[%s1971_s1 + $0x104] sm:$0xf]  ;;  %v1161_v16 = vld [vmem:[%s1971_s1 + $0x110] sm:$0xf0]  ;;  %v1168_v20 = vor.u32 %v1226_v10, %v1167_v9 }
  0x2f   : > { %v1224_v17 = vld [vmem:[%s1971_s1 + $0x10c] sm:$0xf]  ;;  %v1169_v18 = vld [vmem:[%s1971_s1 + $0x118] sm:$0xf0]  ;;  %v1151_v19 = vld [vmem:[%s1971_s1 + $0xe8] sm:$0xf]  ;;  %v1160_v21 = vor.u32 %v1225_v14, %v1159_v13  ;;  %v1164_v25 = vor.u32 %v1223_v15, %v1161_v16 }
  0x30   : > { %v1222_v22 = vld [vmem:[%s1971_s1 + $0xf4] sm:$0xf0]  ;;  %v1235_v23 = vld [vmem:[%s1515_s23] sm:$0xf0]  ;;  %v1236_v24 = vld [vmem:[%s1515_s23] sm:$0xe]  ;;  %v1172_v26 = vor.u32 %v1224_v17, %v1169_v18 }
  0x31   : > { %509 = vmatpush.bf16.msrb.mxu0 %v1094_v36  ;;  %523 = vmatpush.bf16.msrb.mxu1 %v1098_v41  ;;  %v1221_v27 = vld [vmem:[%s1971_s1 + $0xec] sm:$0xf0]  ;;  %v1219_v28 = vld [vmem:[%s1971_s1 + $0xe4] sm:$0xf]  ;;  %v1145_v29 = vld [vmem:[%s1971_s1 + $0xf0] sm:$0xf0]  ;;  %v1237_v32 = vor.u32 %v1236_v24, %v1235_v23  ;;  %v1152_v33 = vor.u32 %v1222_v22, %v1151_v19 }
  0x32   : > { %537 = vmatpush.bf16.msrb.mxu2 %v1102_v35  ;;  %551 = vmatpush.bf16.msrb.mxu3 %v1106_v42  ;;  %v1220_v30 = vld [vmem:[%s1971_s1 + $0xec] sm:$0xf]  ;;  %v1153_v31 = vld [vmem:[%s1971_s1 + $0xf8] sm:$0xf0]  ;;  %v1148_v35 = vor.u32 %v1219_v28, %v1145_v29  ;;  %v580_v38 = vrot.slane %v1523_v1, 1  ;;  %v803_v43 = vld [vmem:[%s1973_s3 + $0x70] sm:$0xff] }
  0x33   : > { %v1156_v36 = vor.u32 %v1220_v30, %v1153_v31  ;;  %v579_v37 = vrot.slane %v1237_v32, 1  ;;  %v804_v1 = vld [vmem:[%s1973_s3 + $0x78] sm:$0xff]  ;;  %v819_v44 = vld [vmem:[%s1973_s3 + $0xf0] sm:$0xff]  ;;  %v802_v45 = vld [vmem:[%s1973_s3 + $0x68] sm:$0xff]  ;;  %s1292_s23 = sshra.s32 %s950_s6, 4  ;;  %s1293_s23 = int_to_ptr.hbm [resolvable:$true] %s1292_s23 }
  0x34   : > { %v820_v42 = vld [vmem:[%s1973_s3 + $0xf8] sm:$0xff]  ;;  %v818_v46 = vld [vmem:[%s1973_s3 + $0xe8] sm:$0xff]  ;;  %v801_v47 = vld [vmem:[%s1973_s3 + $0x60] sm:$0xff]  ;;  %s1294_s8 = scalar_lea.hbm %s1293_s23, 1  ;;  %p1299_p0 = scmp.lt.s32.totalorder %s1293_s23, %s1975_s5 }
  0x35   : > { %510 = vmatpush.bf16.msrb.mxu0 %v1078_v52  ;;  %524 = vmatpush.bf16.msrb.mxu1 %v1082_v55  ;;  %v581_v39 = vsel %vm578_vm3, %v579_v37, %v580_v38  ;;  %v817_v48 = vld [vmem:[%s1973_s3 + $0xe0] sm:$0xff]  ;;  %v852_v52 = vld [vmem:[%s1973_s3 + $0x1f8] sm:$0xff]  ;;  %v834_v62 = vld [vmem:[%s1973_s3 + $0x168] sm:$0xff]  ;;  %p1295_p11 = scmp.ne.s32.totalorder %s1293_s23, %s1294_s8  ;;  %p1300_p1 = scmp.lt.s32.totalorder %s1298_s10, %s1294_s8 }
  0x36   : > { %538 = vmatpush.bf16.msrb.mxu2 %v1086_v49  ;;  %552 = vmatpush.bf16.msrb.mxu3 %v1090_v56  ;;  %v836_v49 = vld [vmem:[%s1973_s3 + $0x178] sm:$0xff]  ;;  %v850_v63 = vld [vmem:[%s1973_s3 + $0x1e8] sm:$0xff]  ;;  %v833_v3 = vld [vmem:[%s1973_s3 + $0x160] sm:$0xff] }
  0x37   : > { %v800_v55 = vld [vmem:[%s1973_s3 + $0x58] sm:$0xff]  ;;  %v798_v0 = vld [vmem:[%s1973_s3 + $0x48] sm:$0xff]  ;;  %v849_v4 = vld [vmem:[%s1973_s3 + $0x1e0] sm:$0xff]  ;;  %p1296_p12 = pnand %p1295_p11, %p1410_p5  ;;  %p1301_p2 = por %p1300_p1, %p1299_p0 }
  0x38   : > { %v816_v56 = vld [vmem:[%s1973_s3 + $0xd8] sm:$0xff]  ;;  %v814_v2 = vld [vmem:[%s1973_s3 + $0xc8] sm:$0xff]  ;;  %v797_v5 = vld [vmem:[%s1973_s3 + $0x40] sm:$0xff] }
  0x39   : > { %671 = vmatpush.bf16.msra.mxu0 %v656_v59  ;;  %685 = vmatpush.bf16.msra.mxu1 %v659_v60  ;;  %v851_v59 = vld [vmem:[%s1973_s3 + $0x1f0] sm:$0xff]  ;;  %v813_v6 = vld [vmem:[%s1973_s3 + $0xc0] sm:$0xff]  ;;  %v848_v10 = vld [vmem:[%s1973_s3 + $0x1d8] sm:$0xff]  ;;  %p1297_p13 = pneg %p1296_p12 }
  0x3a   : > { %699 = vmatpush.bf16.msra.mxu2 %v662_v58  ;;  %713 = vmatpush.bf16.msra.mxu3 %v665_v61  ;;  %v835_v58 = vld [vmem:[%s1973_s3 + $0x170] sm:$0xff]  ;;  %v796_v13 = vld [vmem:[%s1973_s3 + $0x38] sm:$0xff]  ;;  %v830_v19 = vld [vmem:[%s1973_s3 + $0x148] sm:$0xff] }
  0x3b   : > { %1123 = vmatmul.msk.bf16.vlgmr.msrb.gmra.mxu0 %vm346_vm2, %v1518_v57  ;;  %1124 = vmatmul.msk.bf16.vlgmr.msrb.gmra.mxu1 %vm346_vm2, %v1518_v57  ;;  %v799_v60 = vld [vmem:[%s1973_s3 + $0x50] sm:$0xff]  ;;  %v812_v14 = vld [vmem:[%s1973_s3 + $0xb8] sm:$0xff]  ;;  %v810_v22 = vld [vmem:[%s1973_s3 + $0xa8] sm:$0xff]  ;;  %p1302_p3 = pnand %p1301_p2, %p1297_p13 }
  0x3c   : > { %1125 = vmatmul.msk.bf16.vlgmr.msrb.gmra.mxu2 %vm346_vm2, %v1518_v57  ;;  %1126 = vmatmul.msk.bf16.vlgmr.msrb.gmra.mxu3 %vm346_vm2, %v1518_v57  ;;  %v1143_v57 = vld [vmem:[%s1971_s1 + $0xe0] sm:$0xf]  ;;  %v815_v61 = vld [vmem:[%s1973_s3 + $0xd0] sm:$0xff]  ;;  %v844_v29 = vld [vmem:[%s1973_s3 + $0x1b8] sm:$0xff] }
  0x3d   : > { %672 = vmatpush.bf16.msra.mxu0 %v1176_v8  ;;  %686 = vmatpush.bf16.msra.mxu1 %v1180_v11  ;;  %v1144_v34 = vor.u32 %v1221_v27, %v1143_v57  ;;  %v831_v15 = vld [vmem:[%s1973_s3 + $0x150] sm:$0xff]  ;;  %v829_v23 = vld [vmem:[%s1973_s3 + $0x140] sm:$0xff]  ;;  %v828_v57 = vld [vmem:[%s1973_s3 + $0x138] sm:$0xff] }
  0x3e   : > { %700 = vmatpush.bf16.msra.mxu2 %v1184_v7  ;;  %714 = vmatpush.bf16.msra.mxu3 %v1188_v12  ;;  %v832_v7 = vld [vmem:[%s1973_s3 + $0x158] sm:$0xff]  ;;  %v847_v16 = vld [vmem:[%s1973_s3 + $0x1d0] sm:$0xff]  ;;  %v845_v24 = vld [vmem:[%s1973_s3 + $0x1c0] sm:$0xff] }
  0x3f   : > { %v795_v17 = vld [vmem:[%s1973_s3 + $0x30] sm:$0xff]  ;;  %v792_v32 = vld [vmem:[%s1973_s3 + $0x18] sm:$0xff]  ;;  %v826_v38 = vld [vmem:[%s1973_s3 + $0x128] sm:$0xff] }
  0x40   : > { %v811_v18 = vld [vmem:[%s1973_s3 + $0xb0] sm:$0xff] }
  0x41   : > { %673 = vmatpush.bf16.msra.mxu0 %v1160_v21  ;;  %687 = vmatpush.bf16.msra.mxu1 %v1164_v25  ;;  %v794_v21 = vld [vmem:[%s1973_s3 + $0x28] sm:$0xff]  ;;  %v793_v25 = vld [vmem:[%s1973_s3 + $0x20] sm:$0xff]  ;;  %v807_v37 = vld [vmem:[%s1973_s3 + $0x90] sm:$0xff] }
  0x42   : > { %701 = vmatpush.bf16.msra.mxu2 %v1168_v20  ;;  %715 = vmatpush.bf16.msra.mxu3 %v1172_v26  ;;  %v846_v20 = vld [vmem:[%s1973_s3 + $0x1c8] sm:$0xff]  ;;  %v809_v26 = vld [vmem:[%s1973_s3 + $0xa0] sm:$0xff] }
  0x45   : > { %674 = vmatpush.bf16.msra.mxu0 %v1144_v34  ;;  %688 = vmatpush.bf16.msra.mxu1 %v1148_v35  ;;  %v827_v34 = vld [vmem:[%s1973_s3 + $0x130] sm:$0xff] }
  0x46   : > { %702 = vmatpush.bf16.msra.mxu2 %v1152_v33  ;;  %716 = vmatpush.bf16.msra.mxu3 %v1156_v36  ;;  %v808_v33 = vld [vmem:[%s1973_s3 + $0x98] sm:$0xff]  ;;  %v843_v35 = vld [vmem:[%s1973_s3 + $0x1b0] sm:$0xff] }
  0x47   : > { %v791_v36 = vld [vmem:[%s1973_s3 + $0x10] sm:$0xff] }
  0x49   : > { %854 = vmatpush.msrb.mxu0 %v804_v1  ;;  %874 = vmatpush.msrb.mxu1 %v820_v42  ;;  %v790_v1 = vld [vmem:[%s1973_s3 + $0x8] sm:$0xff] }
  0x4a   : > { %894 = vmatpush.msrb.mxu2 %v836_v49  ;;  %914 = vmatpush.msrb.mxu3 %v852_v52  ;;  %v806_v42 = vld [vmem:[%s1973_s3 + $0x88] sm:$0xff]  ;;  %v840_v52 = vld [vmem:[%s1973_s3 + $0x198] sm:$0xff] }
  0x4b   : > { %1189 = vmatmul.msk.bf16.vlgmr.msra.gmra.mxu0 %vm346_vm2, %v581_v39  ;;  %1190 = vmatmul.msk.bf16.vlgmr.msra.gmra.mxu1 %vm346_vm2, %v581_v39 }
  0x4c   : > { %1191 = vmatmul.msk.bf16.vlgmr.msra.gmra.mxu2 %vm346_vm2, %v581_v39  ;;  %1192 = vmatmul.msk.bf16.vlgmr.msra.gmra.mxu3 %vm346_vm2, %v581_v39  ;;  %v842_v39 = vld [vmem:[%s1973_s3 + $0x1a8] sm:$0xff] }
  0x4d   : > { %855 = vmatpush.msrb.mxu0 %v803_v43  ;;  %875 = vmatpush.msrb.mxu1 %v819_v44  ;;  %v825_v43 = vld [vmem:[%s1973_s3 + $0x120] sm:$0xff] }
  0x4e   : > { %895 = vmatpush.msrb.mxu2 %v835_v58  ;;  %915 = vmatpush.msrb.mxu3 %v851_v59  ;;  %v841_v44 = vld [vmem:[%s1973_s3 + $0x1a0] sm:$0xff] }
  0x4f   : > { %856 = vmatpush.msrb.mxu0 %v802_v45  ;;  %876 = vmatpush.msrb.mxu1 %v818_v46  ;;  %v789_v45 = vld [vmem:[%s1973_s3] sm:$0xff] }
  0x50   : > { %896 = vmatpush.msrb.mxu2 %v834_v62  ;;  %916 = vmatpush.msrb.mxu3 %v850_v63  ;;  %v805_v46 = vld [vmem:[%s1973_s3 + $0x80] sm:$0xff] }
  0x51   : > { %857 = vmatpush.msrb.mxu0 %v801_v47  ;;  %877 = vmatpush.msrb.mxu1 %v817_v48  ;;  %v824_v47 = vld [vmem:[%s1973_s3 + $0x118] sm:$0xff]  ;;  %v731_v62 = vld [vmem:[%s1972_s2] sm:$0xf] }
  0x52   : > { %897 = vmatpush.msrb.mxu2 %v833_v3  ;;  %917 = vmatpush.msrb.mxu3 %v849_v4  ;;  %v837_v3 = vld [vmem:[%s1973_s3 + $0x180] sm:$0xff] }
  0x53   : > { %858 = vmatpush.msrb.mxu0 %v800_v55  ;;  %878 = vmatpush.msrb.mxu1 %v816_v56  ;;  %v823_v55 = vld [vmem:[%s1973_s3 + $0x110] sm:$0xff] }
  0x54   : > { %898 = vmatpush.msrb.mxu2 %v832_v7  ;;  %918 = vmatpush.msrb.mxu3 %v848_v10  ;;  %v839_v56 = vld [vmem:[%s1973_s3 + $0x190] sm:$0xff]  ;;  %v734_v7 = vperm.slane %v731_v62, 1 }
  0x55   : > { %859 = vmatpush.msrb.mxu0 %v799_v60  ;;  %879 = vmatpush.msrb.mxu1 %v815_v61  ;;  %v822_v60 = vld [vmem:[%s1973_s3 + $0x108] sm:$0xff] }
  0x56   : > { %899 = vmatpush.msrb.mxu2 %v831_v15  ;;  %919 = vmatpush.msrb.mxu3 %v847_v16  ;;  %v838_v61 = vld [vmem:[%s1973_s3 + $0x188] sm:$0xff] }
  0x57   : > { %860 = vmatpush.msrb.mxu0 %v798_v0  ;;  %880 = vmatpush.msrb.mxu1 %v814_v2  ;;  %v821_v2 = vld [vmem:[%s1973_s3 + $0x100] sm:$0xff] }
  0x58   : > { %900 = vmatpush.msrb.mxu2 %v830_v19  ;;  %920 = vmatpush.msrb.mxu3 %v846_v20 }
  0x59   : > { %861 = vmatpush.msrb.mxu0 %v797_v5  ;;  %881 = vmatpush.msrb.mxu1 %v813_v6  ;;  %v733_v5 = vperm.slane %v731_v62, 0 }
  0x5a   : > { %901 = vmatpush.msrb.mxu2 %v829_v23  ;;  %921 = vmatpush.msrb.mxu3 %v845_v24 }
  0x5b   : > { %862 = vmatpush.msrb.mxu0 %v796_v13  ;;  %882 = vmatpush.msrb.mxu1 %v812_v14 }
  0x5c   : > { %902 = vmatpush.msrb.mxu2 %v828_v57  ;;  %922 = vmatpush.msrb.mxu3 %v844_v29 }
  0x5d   : > { %863 = vmatpush.msrb.mxu0 %v795_v17  ;;  %883 = vmatpush.msrb.mxu1 %v811_v18 }
  0x5e   : > { %903 = vmatpush.msrb.mxu2 %v827_v34  ;;  %923 = vmatpush.msrb.mxu3 %v843_v35 }
  0x5f   : > { %864 = vmatpush.msrb.mxu0 %v794_v21  ;;  %884 = vmatpush.msrb.mxu1 %v810_v22 }
  0x60   : > { %904 = vmatpush.msrb.mxu2 %v826_v38  ;;  %924 = vmatpush.msrb.mxu3 %v842_v39 }
  0x61   : > { %865 = vmatpush.msrb.mxu0 %v793_v25  ;;  %885 = vmatpush.msrb.mxu1 %v809_v26 }
  0x62   : > { %905 = vmatpush.msrb.mxu2 %v825_v43  ;;  %925 = vmatpush.msrb.mxu3 %v841_v44 }
  0x63   : > { %866 = vmatpush.msrb.mxu0 %v792_v32  ;;  %886 = vmatpush.msrb.mxu1 %v808_v33 }
  0x64   : > { %906 = vmatpush.msrb.mxu2 %v824_v47  ;;  %926 = vmatpush.msrb.mxu3 %v840_v52 }
  0x65   : > { %867 = vmatpush.msrb.mxu0 %v791_v36  ;;  %887 = vmatpush.msrb.mxu1 %v807_v37 }
  0x66   : > { %907 = vmatpush.msrb.mxu2 %v823_v55  ;;  %927 = vmatpush.msrb.mxu3 %v839_v56 }
  0x67   : > { %868 = vmatpush.msrb.mxu0 %v790_v1  ;;  %888 = vmatpush.msrb.mxu1 %v806_v42 }
  0x68   : > { %908 = vmatpush.msrb.mxu2 %v822_v60  ;;  %928 = vmatpush.msrb.mxu3 %v838_v61 }
  0x69   : > { %869 = vmatpush.msrb.mxu0 %v789_v45  ;;  %889 = vmatpush.msrb.mxu1 %v805_v46 }
  0x6a   : > { %909 = vmatpush.msrb.mxu2 %v821_v2  ;;  %929 = vmatpush.msrb.mxu3 %v837_v3 }
  0xa8   : > { %v1704_v40 = vpop.f32.mrf.mxu0  ;;  %v1706_v41 = vpop.f32.mrf.mxu1 }
  0xaf   : > { %v1735_v50 = vpop.f32.mrf.mxu2  ;;  %v1737_v51 = vpop.f32.mrf.mxu3 }
  0xb0   : > { %v1742_v53 = vpop.f32.mrf.mxu0  ;;  %v1744_v54 = vpop.f32.mrf.mxu1 }
  0xb7   : > { %v1791_v8 = vpop.f32.mrf.mxu2  ;;  %v1793_v9 = vpop.f32.mrf.mxu3 }
  0xb8   : > { %v1798_v11 = vpop.f32.mrf.mxu0  ;;  %v1800_v12 = vpop.f32.mrf.mxu1 }
  0xb9   : > { %v513_v63 = vadd.f32 %v1798_v11, %v1704_v40  ;;  %v527_v0 = vadd.f32 %v1800_v12, %v1706_v41 }
  0xbf   : > { %v1847_v27 = vpop.f32.mrf.mxu2  ;;  %v1849_v28 = vpop.f32.mrf.mxu3 }
  0xc0   : > { %v514_v30 = vpop.f32.mrf.mxu0  ;;  %v528_v31 = vpop.f32.mrf.mxu1  ;;  %v541_v18 = vadd.f32 %v1847_v27, %v1735_v50  ;;  %v555_v19 = vadd.f32 %v1849_v28, %v1737_v51 }
  0xc1   : > { %v515_v40 = vadd.f32 %v514_v30, %v1742_v53  ;;  %v529_v41 = vadd.f32 %v528_v31, %v1744_v54  ;;  %v735_v53 = vperm.slane %v731_v62, 2  ;;  %v736_v54 = vperm.slane %v731_v62, 3 }
  0xc7   : > { %v542_v48 = vpop.f32.mrf.mxu2  ;;  %v556_v49 = vpop.f32.mrf.mxu3 }
  0xc8   : > { %v676_v58 = vpop.f32.mrf.mxu0  ;;  %v690_v59 = vpop.f32.mrf.mxu1  ;;  %v543_v29 = vadd.f32 %v542_v48, %v1791_v8  ;;  %v557_v30 = vadd.f32 %v556_v49, %v1793_v9 }
  0xc9   : > { %v723_v4 = vadd.f32 %v676_v58, %v513_v63  ;;  %v724_v6 = vadd.f32 %v690_v59, %v527_v0 }
  0xcb   : > { %v741_v14 = vadd.f32 %v733_v5, %v723_v4  ;;  %v742_v15 = vadd.f32 %v734_v7, %v724_v6 }
  0xcd   : > { %v749_v24 = vmax.f32 %v741_v14, 0.0  ;;  %v750_v25 = vmax.f32 %v742_v15, 0.0 }
  0xcf   : > { %v704_v10 = vpop.f32.mrf.mxu2  ;;  %v718_v11 = vpop.f32.mrf.mxu3 }
  0xd0   : > { %v678_v12 = vpop.f32.mrf.mxu0  ;;  %v692_v13 = vpop.f32.mrf.mxu1  ;;  %v725_v22 = vadd.f32 %v704_v10, %v541_v18  ;;  %v726_v23 = vadd.f32 %v718_v11, %v555_v19 }
  0xd1   : > { %v727_v16 = vadd.f32 %v678_v12, %v515_v40  ;;  %v728_v17 = vadd.f32 %v692_v13, %v529_v41  ;;  %v853_v12 = vld [vmem:[%s1974_s4] sm:$0x1] }
  0xd2   : > { %v743_v33 = vadd.f32 %v735_v53, %v725_v22  ;;  %v744_v51 = vadd.f32 %v736_v54, %v726_v23 }
  0xd3   : > { %v745_v20 = vadd.f32 %v733_v5, %v727_v16  ;;  %v746_v21 = vadd.f32 %v734_v7, %v728_v17 }
  0xd4   : > { %v751_v42 = vmax.f32 %v743_v33, 0.0  ;;  %v752_v43 = vmax.f32 %v744_v51, 0.0 }
  0xd5   : > { %v753_v26 = vmax.f32 %v745_v20, 0.0  ;;  %v754_v57 = vmax.f32 %v746_v21, 0.0 }
  0xd7   : > { %v757_v31 = vadd.f32 %v753_v26, %v749_v24  ;;  %v764_v32 = vadd.f32 %v754_v57, %v750_v25  ;;  %v706_v50 = vpop.f32.mrf.mxu2  ;;  %v720_v27 = vpop.f32.mrf.mxu3 }
  0xd8   : > { %v729_v28 = vadd.f32 %v706_v50, %v543_v29  ;;  %v730_v34 = vadd.f32 %v720_v27, %v557_v30 }
  0xd9   : > { %v758_v35 = vrot.slane %v757_v31, 4  ;;  %v765_v36 = vrot.slane %v764_v32, 4 }
  0xda   : > { %v747_v37 = vadd.f32 %v735_v53, %v729_v28  ;;  %v748_v38 = vadd.f32 %v736_v54, %v730_v34 }
  0xdb   : > { %v759_v39 = vadd.f32 %v758_v35, %v757_v31  ;;  %v766_v1 = vadd.f32 %v765_v36, %v764_v32 }
  0xdc   : > { %v755_v44 = vmax.f32 %v747_v37, 0.0  ;;  %v756_v8 = vmax.f32 %v748_v38, 0.0 }
  0xdd   : > { %v760_v45 = vrot.slane %v759_v39, 2  ;;  %v767_v9 = vrot.slane %v766_v1, 2 }
  0xde   : > { %v771_v46 = vadd.f32 %v755_v44, %v751_v42  ;;  %v778_v47 = vadd.f32 %v756_v8, %v752_v43 }
  0xdf   : > { %v761_v48 = vadd.f32 %v760_v45, %v759_v39  ;;  %v768_v49 = vadd.f32 %v767_v9, %v766_v1 }
  0xe0   : > { %v772_v52 = vrot.slane %v771_v46, 4  ;;  %v779_v55 = vrot.slane %v778_v47, 4 }
  0xe1   : > { %v762_v56 = vrot.slane %v761_v48, 1  ;;  %v769_v58 = vrot.slane %v768_v49, 1 }
  0xe2   : > { %v773_v59 = vadd.f32 %v772_v52, %v771_v46  ;;  %v780_v60 = vadd.f32 %v779_v55, %v778_v47 }
  0xe3   : > { %v763_v61 = vadd.f32 %v762_v56, %v761_v48  ;;  %v770_v62 = vadd.f32 %v769_v58, %v768_v49 }
  0xe4   : > { %v774_v63 = vrot.slane %v773_v59, 2  ;;  %v781_v0 = vrot.slane %v780_v60, 2 }
  0xe5   : > { %v785_v2 = vmul.f32 0.00390625, %v763_v61  ;;  %v786_v3 = vmul.f32 0.00390625, %v770_v62 }
  0xe6   : > { %v775_v4 = vadd.f32 %v774_v63, %v773_v59  ;;  %v782_v5 = vadd.f32 %v781_v0, %v780_v60 }
  0xe7   : > { %870 = vmatmul.f32.vlgmr.msrb.gmra.mxu0 %v785_v2  ;;  %890 = vmatmul.f32.vlgmr.msrb.gmra.mxu1 %v786_v3 }
  0xe8   : > { %v776_v6 = vrot.slane %v775_v4, 1  ;;  %v783_v7 = vrot.slane %v782_v5, 1 }
  0xea   : > { %v777_v40 = vadd.f32 %v776_v6, %v775_v4  ;;  %v784_v41 = vadd.f32 %v783_v7, %v782_v5 }
  0xec   : > { %v787_v10 = vmul.f32 0.00390625, %v777_v40  ;;  %v788_v11 = vmul.f32 0.00390625, %v784_v41 }
  0xee   : > { %910 = vmatmul.f32.vlgmr.msrb.gmra.mxu2 %v787_v10  ;;  %930 = vmatmul.f32.vlgmr.msrb.gmra.mxu3 %v788_v11 }
 0x164   : > { %v871_v13 = vpop.f32.mrf.mxu0  ;;  %v891_v15 = vpop.f32.mrf.mxu1 }
 0x165   : > { %v872_v14 = vadd.f32 %v871_v13, %v853_v12 }
 0x167   : > { %v892_v16 = vadd.f32 %v891_v15, %v872_v14 }
 0x171   : > { %v911_v17 = vpop.f32.mrf.mxu2  ;;  %v931_v19 = vpop.f32.mrf.mxu3 }
 0x172   : > { %v912_v18 = vadd.f32 %v911_v17, %v892_v16 }
 0x174   : > { %v932_v20 = vadd.f32 %v931_v19, %v912_v18 }
 0x176   : > { %935 = vst.msk [vmem:[%s216_s26] sm:$0x1] %vm934_vm4, %v932_v20 }
 0x177   : > { %1305 = shalt.err (!%p1302_p3)
}
 0x178   : > { %1239 = dma.vmem_to_hbm [thread:$0]  (%p1410_p5), %s948_s30, 16, %s950_s6, %s937_s7  }
 0x179 PF: > { %p1245_p4 = scmp.ge.s32.totalorder %s1340_s21, 2  ;;  %s961_s13 = sand.u32 1, %s1328_s18  }
 0x17a   : > { %s962_s14 = scalar_lea.sflag [#allocation3], %s961_s13 }
 0x17b   : > { %p1242_p7 = pnand %p1245_p4, %p1414_p6 }
 0x17d   : > { %p1243_p8 = pneg %p1242_p7 }
 0x17f   : > { %1323 = dma.done.wait (%p1243_p8), %s962_s14, 16  }
 0x180   : > { %1325 = vsyncadd (%p1243_p8), %s962_s14, 4294967280  ;;  %p15_p9 = scmp.ge.s32.totalorder %s1397_s24, 4   ;;  %s1978_s18 = smov %s1332_s19 }
 0x181   : > { %s1979_s19 = smov %s1336_s20  ;;  %s1980_s20 = smov %s1408_s27 }
 0x182   : > { %s1981_s21 = smov %s1397_s24  ;;  %17 = sbr.rel (!%p15_p9) target bundleno = 3 (0x3), region = 77 }
 0x187   :  { %967 = vsyncpa [#allocation3], 1 }
 0x188   :  { %969 = vsyncpa [#allocation3 + $0x1], 1 }

</bundles_post_ra>
